<compile_context>
chip_gen: v7x
topology: tpu7x:2x2x1
jax: 0.10.0
libtpu: 0.0.40
codegen_flags: <defaults>
</compile_context>

<pallas_src>
import jax
import jax.numpy as jnp
from jax.experimental import pallas as pl
from jax.experimental.pallas import tpu as pltpu


# ----------------------------------------------------------------------------
# Parameter construction (deterministic, mirrors ExampleDuplicateModel.__init__)
# These are intentionally unused by forward(), exactly like the PyTorch module.
# ----------------------------------------------------------------------------
def build_params():
    def det(shape, scale=0.01):
        n = 1
        for s in shape:
            n *= s
        return jnp.arange(n, dtype=jnp.float32).reshape(shape) * scale

    params = {
        "param1": jnp.ones((1,), jnp.float32),
        # conv1: Conv2d(3, 4, kernel_size=1, bias=False) -> weight (4, 3, 1, 1)
        "conv1_w": det((4, 3, 1, 1)),
        # conv2: Conv2d(4, 2, kernel_size=1) -> weight (2, 4, 1, 1), bias (2,)
        "conv2_w": det((2, 4, 1, 1)),
        "conv2_b": jnp.zeros((2,), jnp.float32),
        # bn: BatchNorm2d(2)
        "bn_gamma": jnp.ones((2,), jnp.float32),
        "bn_beta": jnp.zeros((2,), jnp.float32),
        # sub: SubModel -> Conv2d(2, 2, k=1, groups=2) weight (2, 1, 1, 1), bias (2,)
        "sub_conv1_w": det((2, 1, 1, 1)),
        "sub_conv1_b": jnp.zeros((2,), jnp.float32),
        "sub_gn_gamma": jnp.ones((2,), jnp.float32),
        "sub_gn_beta": jnp.zeros((2,), jnp.float32),
        "sub_param1": jnp.ones((1,), jnp.float32),
    }
    # conv3 shares conv1's weight (self.conv3[0] = self.conv1[0])
    params["conv3_w"] = params["conv1_w"]
    # TODO(synk): DeformConv2dPack branch (MMCV_FULL_AVAILABLE) not constructed;
    # it is also unused in forward().
    return params


# ----------------------------------------------------------------------------
# Pallas kernel: identity (element-wise pass-through of x)
# ----------------------------------------------------------------------------
def _copy_kernel(x_ref, o_ref):
    o_ref[...] = x_ref[...]


def _choose_row_block(rows, lanes, itemsize, max_block_bytes=2 * 1024 * 1024):
    """Largest row block that divides `rows`, is a multiple of 8 (or == rows),
    and keeps one block within `max_block_bytes`.  With double-buffered input
    and output blocks this stays well inside the scoped-VMEM defaults on
    v5e (16 MiB) and the smaller physical VMEM on v7x (64 MiB)."""
    if rows * lanes * itemsize <= max_block_bytes:
        return rows
    cap = max((max_block_bytes // (lanes * itemsize)) // 8 * 8, 8)
    for rb in range(cap, 0, -8):
        if rows % rb == 0:
            return rb
    return rows  # ragged fallback: single full block


def example_duplicate_model_forward(x):
    """Forward of ExampleDuplicateModel: returns x unchanged (identity)."""
    orig_shape = x.shape
    total = x.size

    # Collapse trailing contiguous dims into the lane axis until it is a
    # multiple of 128 (row-major collapse => layout-preserving, free reshape).
    # For NCHW (2,3,16,16) this gives a (6, 256) lane-dense slab.
    if x.ndim <= 1:
        rows, lanes = 1, max(total, 1)
    else:
        lanes, i = 1, x.ndim
        while i > 1 and lanes % 128 != 0:
            i -= 1
            lanes *= orig_shape[i]
        rows = total // lanes

    x2d = x.reshape(rows, lanes)
    row_block = _choose_row_block(rows, lanes, x.dtype.itemsize)
    grid = (rows // row_block,)

    out2d = pl.pallas_call(
        _copy_kernel,
        out_shape=jax.ShapeDtypeStruct((rows, lanes), x.dtype),
        grid=grid,
        in_specs=[pl.BlockSpec((row_block, lanes), lambda i: (i, 0))],
        out_specs=pl.BlockSpec((row_block, lanes), lambda i: (i, 0)),
        input_output_aliases={0: 0},
        compiler_params=pltpu.CompilerParams(
            dimension_semantics=("parallel",)),
    )(x2d)

    return out2d.reshape(orig_shape)


if __name__ == "__main__":
    _ = build_params()  # parameters exist (as in the PyTorch module) but are unused

    key = jax.random.PRNGKey(0)
    # conv1 in __init__ expects 3 input channels -> NCHW (2, 3, 16, 16)
    x = jax.random.normal(key, (2, 3, 16, 16), dtype=jnp.float32)

    fwd = jax.jit(example_duplicate_model_forward)
    y = fwd(x)
    y = jax.block_until_ready(y)

    assert y.shape == x.shape and y.dtype == x.dtype
    assert bool(jnp.all(y == x)), "identity forward mismatch"
    print("KERNEL_OK")
</pallas_src>

<mosaic_0001>
module attributes {stable_mosaic.version = 11 : i64} {
  func.func @_copy_kernel(%arg0: i32, %arg1: memref<6x256xf32, #tpu.memory_space<vmem>>, %arg2: memref<6x256xf32, #tpu.memory_space<vmem>>) attributes {dimension_semantics = [#tpu.dimension_semantics<parallel>], iteration_bounds = array<i64: 1>, scalar_prefetch = 0 : i64, scratch_operands = 0 : i64, tpu.core_type = #tpu.core_type<tc>, window_params = [{transform_indices = @transform_0, window_bounds = array<i64: 6, 256>}, {transform_indices = @transform_1, window_bounds = array<i64: 6, 256>}]} {
    %c0 = arith.constant 0 : index
    %c0_0 = arith.constant 0 : index
    %0 = vector.load %arg1[%c0, %c0_0] : memref<6x256xf32, #tpu.memory_space<vmem>>, vector<6x256xf32>
    %c0_1 = arith.constant 0 : index
    %c0_2 = arith.constant 0 : index
    %1 = vector.load %arg2[%c0_1, %c0_2] : memref<6x256xf32, #tpu.memory_space<vmem>>, vector<6x256xf32>
    tpu.vector_store %arg2[%c0_1, %c0_2], %0 {strides = array<i32>} : memref<6x256xf32, #tpu.memory_space<vmem>>, vector<6x256xf32>,
    return
  }
  func.func @transform_0(%arg0: i32) -> (i32, i32) {
    %c0_i32 = arith.constant 0 : i32
    %c0_i32_0 = arith.constant 0 : i32
    return %arg0, %c0_i32 : i32, i32
  }
  func.func @transform_1(%arg0: i32) -> (i32, i32) {
    %c0_i32 = arith.constant 0 : i32
    %c0_i32_0 = arith.constant 0 : i32
    return %arg0, %c0_i32 : i32, i32
  }
}

</mosaic_0001>

<bundles_post_ra>
// kernel: example_duplicate_model_forward.1
= control target key start
LH: loop header
LB: loop body
LE: loop exit
PB: predicated region body
PF: predicated region fallthrough
CT: control target
= control target key end

     0   :  { %s38_s0 = inlined_call_operand.vmem [shape: f32[6,256], index: 0, kind: input, shape index: {}, may-alias: {0,1}]   ;;  %s39_s1 = inlined_call_operand.vmem [shape: f32[6,256], index: 1, kind: output, shape index: {}, may-alias: {0,1}]  }
   0x1   :  { %v8_v0 = vld [vmem:[%s38_s0] sm:$0x3f]  ;;  %v9_v1 = vld [vmem:[%s38_s0 + $0x8] sm:$0x3f] }
   0x2   :  { %10 = vst [vmem:[%s39_s1] sm:$0x3f] %v8_v0  ;;  %11 = vst [vmem:[%s39_s1 + $0x8] sm:$0x3f] %v9_v1 }

</bundles_post_ra>
